<compile_context>
chip_gen: v6e
topology: v6e:2x2x1
jax: 0.10.0
libtpu: 0.0.40
codegen_flags: <defaults>
</compile_context>

<pallas_src>
import math
import functools

import jax
import jax.numpy as jnp
from jax.experimental import pallas as pl
from jax.experimental.pallas import tpu as pltpu


def _round_up(x, m):
    return ((x + m - 1) // m) * m


# ----------------------------------------------------------------------------
# Activations (usable both inside the kernel and in the pure-JAX reference)
# ----------------------------------------------------------------------------
def _apply_activation(h, name):
    if name == 'relu':
        return jnp.maximum(h, 0.0)
    elif name == 'tanh':
        return jnp.tanh(h)
    elif name == 'sigmoid':
        return jax.nn.sigmoid(h)
    elif name == 'leaky_relu':
        return jnp.where(h > 0, h, 0.1 * h)
    elif name == 'elu':
        return jnp.where(h > 0, h, jnp.exp(h) - 1.0)
    elif name == 'selu':
        alpha = 1.6732632423543772
        scale = 1.0507009873554805
        return scale * jnp.where(h > 0, h, alpha * (jnp.exp(h) - 1.0))
    elif name is None:
        return h
    else:
        raise ValueError('Invalid activation function')


# ----------------------------------------------------------------------------
# Reference positional embedding (matches PyTorch PositionalEmbedding.forward)
# ----------------------------------------------------------------------------
def positional_embedding_ref(x, L):
    freq_bands = 2.0 ** jnp.linspace(0.0, L - 1, L, dtype=jnp.float32)      # (L,)
    x_scaled = x[..., None] * freq_bands * math.pi                          # (B, D, L)
    emb = jnp.concatenate([jnp.sin(x_scaled), jnp.cos(x_scaled)], axis=-1)  # (B, D, 2L)
    return emb.reshape(x.shape[0], -1)


# ----------------------------------------------------------------------------
# Fused-embedding constants:  embedded = sin(obs @ M + phase)
#   column j = d*2L + k :  k <  L -> sin(obs[:, d] * freq[k]   * pi)
#                          k >= L -> cos(obs[:, d] * freq[k-L] * pi)
#                                  = sin(obs[:, d] * freq[k-L] * pi + pi/2)
# M keeps its K-dim at obs_dim (no row padding); padded columns are zero.
# ----------------------------------------------------------------------------
def _build_embedding_constants(obs_dim, L):
    d_emb = obs_dim * 2 * L
    d_emb_pad = _round_up(d_emb, 128)
    freq = 2.0 ** jnp.linspace(0.0, L - 1, L, dtype=jnp.float32)            # (L,)
    freq2 = jnp.concatenate([freq, freq]) * math.pi                         # (2L,)
    m_core = (jnp.eye(obs_dim, dtype=jnp.float32)[:, :, None]
              * freq2[None, None, :]).reshape(obs_dim, d_emb)               # (D, 2LD)
    phase_core = jnp.tile(
        jnp.concatenate([jnp.zeros((L,), jnp.float32),
                         jnp.full((L,), math.pi / 2.0, jnp.float32)]),
        obs_dim)[None, :]                                                   # (1, 2LD)
    m = jnp.zeros((obs_dim, d_emb_pad), jnp.float32).at[:, :d_emb].set(m_core)
    phase = jnp.zeros((1, d_emb_pad), jnp.float32).at[:, :d_emb].set(phase_core)
    return m, phase


# ----------------------------------------------------------------------------
# One-time parameter preparation (hoisted out of the per-call forward path)
# ----------------------------------------------------------------------------
def prepare_actor_params(params, action_scale, action_bias, *, obs_dim,
                         embedding_L=None, weights_dtype=jnp.bfloat16):
    """Pad/cast all constants once.  `params` is a list of (W, b), W:(in,out)."""
    LANE = 128
    n_layers = len(params)
    action_dim = params[-1][0].shape[1]
    has_embedding = embedding_L is not None

    inputs = []
    if has_embedding:
        m, phase = _build_embedding_constants(obs_dim, embedding_L)
        inputs += [m, phase]                       # keep f32 (phase precision)
        cur_pad = m.shape[1]
    else:
        cur_pad = obs_dim

    for li, (w, b) in enumerate(params):
        din, dout = w.shape
        last = (li == n_layers - 1)
        dout_pad = dout if last else _round_up(dout, LANE)   # last layer unpadded
        wp = (jnp.zeros((cur_pad, dout_pad), jnp.float32)
              .at[:din, :dout].set(jnp.asarray(w, jnp.float32))
              .astype(weights_dtype))
        bp = (jnp.zeros((1, dout_pad), jnp.float32)
              .at[:, :dout].set(jnp.asarray(b, jnp.float32).reshape(1, dout)))
        inputs += [wp, bp]
        cur_pad = dout_pad

    scale = jnp.asarray(action_scale, jnp.float32).reshape(1, action_dim)
    bias = jnp.asarray(action_bias, jnp.float32).reshape(1, action_dim)
    inputs += [scale, bias]

    # TODO(synk): for very large hidden layers (weights > ~16 MiB) pack the
    # weights into one slab and add a K/N reduction grid axis + VMEM accumulator
    # instead of whole-network VMEM residency.
    return dict(inputs=inputs, n_layers=n_layers, has_embedding=has_embedding,
                obs_dim=obs_dim, action_dim=action_dim)


# ----------------------------------------------------------------------------
# Pallas kernel: fused embedding + MLP + output activation + action scale/bias
# ----------------------------------------------------------------------------
def _actor_kernel(n_layers, has_embedding, activation, output_activation, *refs):
    idx = 0
    x_ref = refs[idx]; idx += 1
    if has_embedding:
        m_ref, phase_ref = refs[idx], refs[idx + 1]
        idx += 2
    layer_refs = refs[idx: idx + 2 * n_layers]; idx += 2 * n_layers
    scale_ref, bias_ref, o_ref = refs[idx], refs[idx + 1], refs[idx + 2]

    h = x_ref[...]                                       # (TB, obs_dim) f32
    if has_embedding:
        # Fused positional embedding: tiny f32 matmul on MXU, sin on the EUP.
        h = jnp.sin(jnp.dot(h, m_ref[...], preferred_element_type=jnp.float32)
                    + phase_ref[...])

    for li in range(n_layers):
        w = layer_refs[2 * li][...]
        b = layer_refs[2 * li + 1][...]                  # (1, dout[_pad]) f32
        # bf16 operands (if weights_dtype=bf16), f32 accumulation on the MXU.
        h = jnp.dot(h.astype(w.dtype), w, preferred_element_type=jnp.float32) + b
        h = _apply_activation(h, activation if li < n_layers - 1 else output_activation)

    o_ref[...] = (h * scale_ref[...] + bias_ref[...]).astype(o_ref.dtype)


# ----------------------------------------------------------------------------
# Batch-tile choice: big tiles to amortize per-step overhead, but >=2 grid
# steps when the batch allows so the 'parallel' axis spans both TCs on v7x.
# ----------------------------------------------------------------------------
def _choose_batch_tile(b_pad):
    if b_pad <= 8:
        return b_pad
    for tb in (256, 128, 64, 32, 16, 8):
        if b_pad % tb == 0 and b_pad // tb >= 2:
            return tb
    return 8


# ----------------------------------------------------------------------------
# Wrapper: batch tiling + pallas_call (no parameter padding here)
# ----------------------------------------------------------------------------
def actor_forward(obs, prepared, *, activation='relu', output_activation='tanh'):
    B, obs_dim = obs.shape
    assert obs_dim == prepared['obs_dim']
    A = prepared['action_dim']
    n_layers = prepared['n_layers']
    has_embedding = prepared['has_embedding']
    consts = prepared['inputs']

    SUB = 8
    B_pad = _round_up(B, SUB)
    TB = _choose_batch_tile(B_pad)

    obs_f32 = obs.astype(jnp.float32)
    if B_pad != B:
        obs_p = jnp.zeros((B_pad, obs_dim), jnp.float32).at[:B].set(obs_f32)
    else:
        obs_p = obs_f32

    kernel = functools.partial(_actor_kernel, n_layers, has_embedding,
                               activation, output_activation)
    grid = (B_pad // TB,)

    def build_call(single_buffer_consts):
        def const_spec(arr):
            # Constants are loaded once (index_map always (0,0)); single-buffer
            # them to halve their VMEM footprint (matters on v7x's 64 MiB VMEM).
            if single_buffer_consts:
                return pl.BlockSpec(arr.shape, lambda i: (0, 0),
                                    pipeline_mode=pl.Buffered(1))
            return pl.BlockSpec(arr.shape, lambda i: (0, 0))

        in_specs = [pl.BlockSpec((TB, obs_dim), lambda i: (i, 0))]
        in_specs += [const_spec(a) for a in consts]
        out_spec = pl.BlockSpec((TB, A), lambda i: (i, 0))

        return pl.pallas_call(
            kernel,
            out_shape=jax.ShapeDtypeStruct((B_pad, A), jnp.float32),
            grid=grid,
            in_specs=in_specs,
            out_specs=out_spec,
            compiler_params=pltpu.CompilerParams(
                dimension_semantics=("parallel",),
                vmem_limit_bytes=48 * 1024 * 1024),
        )

    try:
        out_padded = build_call(True)(obs_p, *consts)
    except Exception:
        # Fallback if this JAX version rejects pipeline_mode on the grid pipeline.
        out_padded = build_call(False)(obs_p, *consts)

    return out_padded[:B] if B_pad != B else out_padded


# ----------------------------------------------------------------------------
# Deterministic parameter construction (mimics nn.Linear uniform init)
# ----------------------------------------------------------------------------
def init_actor_params(key, obs_dim, hidden_dims, action_dim, embedding_L=None):
    if embedding_L is not None:
        obs_dim = obs_dim * 2 * embedding_L
    dims = [obs_dim] + list(hidden_dims) + [action_dim]
    params = []
    for din, dout in zip(dims[:-1], dims[1:]):
        key, kw, kb = jax.random.split(key, 3)
        bound = 1.0 / math.sqrt(din)
        w = jax.random.uniform(kw, (din, dout), jnp.float32, -bound, bound)
        b = jax.random.uniform(kb, (1, dout), jnp.float32, -bound, bound)
        params.append((w, b))
    return params


# ----------------------------------------------------------------------------
# Pure-JAX reference (matches PyTorch Actor.forward)
# ----------------------------------------------------------------------------
def actor_reference(obs, params, action_scale, action_bias, embedding_L=None,
                    activation='relu', output_activation='tanh'):
    if embedding_L is not None:
        obs = positional_embedding_ref(obs, embedding_L)
    h = obs
    for i, (w, b) in enumerate(params):
        h = h @ w + jnp.asarray(b).reshape(1, -1)
        h = _apply_activation(h, activation if i < len(params) - 1 else output_activation)
    return (h * jnp.asarray(action_scale).reshape(1, -1)
            + jnp.asarray(action_bias).reshape(1, -1))


if __name__ == "__main__":
    key = jax.random.PRNGKey(0)

    # Small synthetic problem: obs_dim=16, hidden_dims=[32, 32], action_dim=4,
    # positional embedding with L=4 -> effective input dim 16*2*4 = 128.
    batch = 2
    obs_dim = 16
    hidden_dims = [32, 32]
    action_dim = 4
    embedding_L = 4

    # Synthetic action space: low=-1, high=3  -> scale=2, bias=1
    action_low = jnp.full((action_dim,), -1.0, jnp.float32)
    action_high = jnp.full((action_dim,), 3.0, jnp.float32)
    action_scale = (action_high - action_low) / 2.0
    action_bias = (action_high + action_low) / 2.0

    key, k_obs, k_params = jax.random.split(key, 3)
    obs = jax.random.normal(k_obs, (batch, obs_dim), jnp.float32)
    params = init_actor_params(k_params, obs_dim, hidden_dims, action_dim,
                               embedding_L=embedding_L)

    ref = actor_reference(obs, params, action_scale, action_bias,
                          embedding_L=embedding_L)

    # f32 path: tight correctness check.
    prepared_f32 = prepare_actor_params(params, action_scale, action_bias,
                                        obs_dim=obs_dim, embedding_L=embedding_L,
                                        weights_dtype=jnp.float32)
    out_f32 = jax.block_until_ready(actor_forward(obs, prepared_f32))
    assert out_f32.shape == (batch, action_dim)
    assert jnp.allclose(out_f32, ref, atol=1e-4, rtol=1e-4), "f32 mismatch vs reference"

    # bf16 matmul-operand path (perf default): looser tolerance.
    prepared_bf16 = prepare_actor_params(params, action_scale, action_bias,
                                         obs_dim=obs_dim, embedding_L=embedding_L,
                                         weights_dtype=jnp.bfloat16)
    out_bf16 = jax.block_until_ready(actor_forward(obs, prepared_bf16))
    assert out_bf16.shape == (batch, action_dim)
    assert jnp.allclose(out_bf16, ref, atol=1e-1), "bf16 mismatch vs reference"

    print("KERNEL_OK")
</pallas_src>

<mosaic_0001>
module attributes {stable_mosaic.version = 11 : i64} {
  func.func @_actor_kernel(%arg0: i32, %arg1: memref<8x16xf32, #tpu.memory_space<vmem>>, %arg2: memref<16x128xf32, #tpu.memory_space<vmem>>, %arg3: memref<1x128xf32, #tpu.memory_space<vmem>>, %arg4: memref<128x128xf32, #tpu.memory_space<vmem>>, %arg5: memref<1x128xf32, #tpu.memory_space<vmem>>, %arg6: memref<128x128xf32, #tpu.memory_space<vmem>>, %arg7: memref<1x128xf32, #tpu.memory_space<vmem>>, %arg8: memref<128x4xf32, #tpu.memory_space<vmem>>, %arg9: memref<1x4xf32, #tpu.memory_space<vmem>>, %arg10: memref<1x4xf32, #tpu.memory_space<vmem>>, %arg11: memref<1x4xf32, #tpu.memory_space<vmem>>, %arg12: memref<8x4xf32, #tpu.memory_space<vmem>>) attributes {dimension_semantics = [#tpu.dimension_semantics<parallel>], iteration_bounds = array<i64: 1>, scalar_prefetch = 0 : i64, scratch_operands = 0 : i64, tpu.core_type = #tpu.core_type<tc>, window_params = [{transform_indices = @transform_0, window_bounds = array<i64: 8, 16>}, {pipeline_mode = #tpu.pipeline_mode<synchronous>, transform_indices = @transform_1, window_bounds = array<i64: 16, 128>}, {pipeline_mode = #tpu.pipeline_mode<synchronous>, transform_indices = @transform_2, window_bounds = array<i64: 1, 128>}, {pipeline_mode = #tpu.pipeline_mode<synchronous>, transform_indices = @transform_3, window_bounds = array<i64: 128, 128>}, {pipeline_mode = #tpu.pipeline_mode<synchronous>, transform_indices = @transform_4, window_bounds = array<i64: 1, 128>}, {pipeline_mode = #tpu.pipeline_mode<synchronous>, transform_indices = @transform_5, window_bounds = array<i64: 128, 128>}, {pipeline_mode = #tpu.pipeline_mode<synchronous>, transform_indices = @transform_6, window_bounds = array<i64: 1, 128>}, {pipeline_mode = #tpu.pipeline_mode<synchronous>, transform_indices = @transform_7, window_bounds = array<i64: 128, 4>}, {pipeline_mode = #tpu.pipeline_mode<synchronous>, transform_indices = @transform_8, window_bounds = array<i64: 1, 4>}, {pipeline_mode = #tpu.pipeline_mode<synchronous>, transform_indices = @transform_9, window_bounds = array<i64: 1, 4>}, {pipeline_mode = #tpu.pipeline_mode<synchronous>, transform_indices = @transform_10, window_bounds = array<i64: 1, 4>}, {transform_indices = @transform_11, window_bounds = array<i64: 8, 4>}]} {
    %c0 = arith.constant 0 : index
    %c0_0 = arith.constant 0 : index
    %0 = vector.load %arg1[%c0, %c0_0] : memref<8x16xf32, #tpu.memory_space<vmem>>, vector<8x16xf32>
    %c0_1 = arith.constant 0 : index
    %c0_2 = arith.constant 0 : index
    %1 = vector.load %arg2[%c0_1, %c0_2] : memref<16x128xf32, #tpu.memory_space<vmem>>, vector<16x128xf32>
    %cst = arith.constant dense<0.000000e+00> : vector<8x128xf32>
    %2 = tpu.matmul %0, %1, %cst {dimension_numbers = #tpu.dot_dimension_numbers<[1], [0], [0], [1], [0, 0, 1, 1], [], []>} : vector<8x16xf32>, vector<16x128xf32>, vector<8x128xf32> -> vector<8x128xf32>
    %c0_3 = arith.constant 0 : index
    %c0_4 = arith.constant 0 : index
    %3 = vector.load %arg3[%c0_3, %c0_4] : memref<1x128xf32, #tpu.memory_space<vmem>>, vector<1x128xf32>
    %4 = vector.broadcast %3 : vector<1x128xf32> to vector<8x128xf32>
    %5 = arith.addf %2, %4 : vector<8x128xf32>
    %6 = math.sin %5 : vector<8x128xf32>
    %c0_5 = arith.constant 0 : index
    %c0_6 = arith.constant 0 : index
    %7 = vector.load %arg4[%c0_5, %c0_6] : memref<128x128xf32, #tpu.memory_space<vmem>>, vector<128x128xf32>
    %c0_7 = arith.constant 0 : index
    %c0_8 = arith.constant 0 : index
    %8 = vector.load %arg5[%c0_7, %c0_8] : memref<1x128xf32, #tpu.memory_space<vmem>>, vector<1x128xf32>
    %cst_9 = arith.constant dense<0.000000e+00> : vector<8x128xf32>
    %9 = tpu.matmul %6, %7, %cst_9 {dimension_numbers = #tpu.dot_dimension_numbers<[1], [0], [0], [1], [0, 0, 1, 1], [], []>} : vector<8x128xf32>, vector<128x128xf32>, vector<8x128xf32> -> vector<8x128xf32>
    %10 = vector.broadcast %8 : vector<1x128xf32> to vector<8x128xf32>
    %11 = arith.addf %9, %10 : vector<8x128xf32>
    %cst_10 = arith.constant 0.000000e+00 : f32
    %12 = vector.broadcast %cst_10 : f32 to vector<8x128xf32>
    %13 = arith.maximumf %11, %12 : vector<8x128xf32>
    %c0_11 = arith.constant 0 : index
    %c0_12 = arith.constant 0 : index
    %14 = vector.load %arg6[%c0_11, %c0_12] : memref<128x128xf32, #tpu.memory_space<vmem>>, vector<128x128xf32>
    %c0_13 = arith.constant 0 : index
    %c0_14 = arith.constant 0 : index
    %15 = vector.load %arg7[%c0_13, %c0_14] : memref<1x128xf32, #tpu.memory_space<vmem>>, vector<1x128xf32>
    %cst_15 = arith.constant dense<0.000000e+00> : vector<8x128xf32>
    %16 = tpu.matmul %13, %14, %cst_15 {dimension_numbers = #tpu.dot_dimension_numbers<[1], [0], [0], [1], [0, 0, 1, 1], [], []>} : vector<8x128xf32>, vector<128x128xf32>, vector<8x128xf32> -> vector<8x128xf32>
    %17 = vector.broadcast %15 : vector<1x128xf32> to vector<8x128xf32>
    %18 = arith.addf %16, %17 : vector<8x128xf32>
    %cst_16 = arith.constant 0.000000e+00 : f32
    %19 = vector.broadcast %cst_16 : f32 to vector<8x128xf32>
    %20 = arith.maximumf %18, %19 : vector<8x128xf32>
    %c0_17 = arith.constant 0 : index
    %c0_18 = arith.constant 0 : index
    %21 = vector.load %arg8[%c0_17, %c0_18] : memref<128x4xf32, #tpu.memory_space<vmem>>, vector<128x4xf32>
    %c0_19 = arith.constant 0 : index
    %c0_20 = arith.constant 0 : index
    %22 = vector.load %arg9[%c0_19, %c0_20] : memref<1x4xf32, #tpu.memory_space<vmem>>, vector<1x4xf32>
    %cst_21 = arith.constant dense<0.000000e+00> : vector<8x4xf32>
    %23 = tpu.matmul %20, %21, %cst_21 {dimension_numbers = #tpu.dot_dimension_numbers<[1], [0], [0], [1], [0, 0, 1, 1], [], []>} : vector<8x128xf32>, vector<128x4xf32>, vector<8x4xf32> -> vector<8x4xf32>
    %24 = vector.broadcast %22 : vector<1x4xf32> to vector<8x4xf32>
    %25 = arith.addf %23, %24 : vector<8x4xf32>
    %26 = math.tanh %25 : vector<8x4xf32>
    %c0_22 = arith.constant 0 : index
    %c0_23 = arith.constant 0 : index
    %27 = vector.load %arg10[%c0_22, %c0_23] : memref<1x4xf32, #tpu.memory_space<vmem>>, vector<1x4xf32>
    %28 = vector.broadcast %27 : vector<1x4xf32> to vector<8x4xf32>
    %29 = arith.mulf %26, %28 : vector<8x4xf32>
    %c0_24 = arith.constant 0 : index
    %c0_25 = arith.constant 0 : index
    %30 = vector.load %arg11[%c0_24, %c0_25] : memref<1x4xf32, #tpu.memory_space<vmem>>, vector<1x4xf32>
    %31 = vector.broadcast %30 : vector<1x4xf32> to vector<8x4xf32>
    %32 = arith.addf %29, %31 : vector<8x4xf32>
    %c0_26 = arith.constant 0 : index
    %c0_27 = arith.constant 0 : index
    %33 = vector.load %arg12[%c0_26, %c0_27] : memref<8x4xf32, #tpu.memory_space<vmem>>, vector<8x4xf32>
    tpu.vector_store %arg12[%c0_26, %c0_27], %32 {strides = array<i32>} : memref<8x4xf32, #tpu.memory_space<vmem>>, vector<8x4xf32>,
    return
  }
  func.func @transform_0(%arg0: i32) -> (i32, i32) {
    %c0_i32 = arith.constant 0 : i32
    %c0_i32_0 = arith.constant 0 : i32
    return %arg0, %c0_i32 : i32, i32
  }
  func.func @transform_1(%arg0: i32) -> (i32, i32) {
    %c0_i32 = arith.constant 0 : i32
    %c0_i32_0 = arith.constant 0 : i32
    %c0_i32_1 = arith.constant 0 : i32
    return %c0_i32, %c0_i32_0 : i32, i32
  }
  func.func @transform_2(%arg0: i32) -> (i32, i32) {
    %c0_i32 = arith.constant 0 : i32
    %c0_i32_0 = arith.constant 0 : i32
    %c0_i32_1 = arith.constant 0 : i32
    return %c0_i32, %c0_i32_0 : i32, i32
  }
  func.func @transform_3(%arg0: i32) -> (i32, i32) {
    %c0_i32 = arith.constant 0 : i32
    %c0_i32_0 = arith.constant 0 : i32
    %c0_i32_1 = arith.constant 0 : i32
    return %c0_i32, %c0_i32_0 : i32, i32
  }
  func.func @transform_4(%arg0: i32) -> (i32, i32) {
    %c0_i32 = arith.constant 0 : i32
    %c0_i32_0 = arith.constant 0 : i32
    %c0_i32_1 = arith.constant 0 : i32
    return %c0_i32, %c0_i32_0 : i32, i32
  }
  func.func @transform_5(%arg0: i32) -> (i32, i32) {
    %c0_i32 = arith.constant 0 : i32
    %c0_i32_0 = arith.constant 0 : i32
    %c0_i32_1 = arith.constant 0 : i32
    return %c0_i32, %c0_i32_0 : i32, i32
  }
  func.func @transform_6(%arg0: i32) -> (i32, i32) {
    %c0_i32 = arith.constant 0 : i32
    %c0_i32_0 = arith.constant 0 : i32
    %c0_i32_1 = arith.constant 0 : i32
    return %c0_i32, %c0_i32_0 : i32, i32
  }
  func.func @transform_7(%arg0: i32) -> (i32, i32) {
    %c0_i32 = arith.constant 0 : i32
    %c0_i32_0 = arith.constant 0 : i32
    %c0_i32_1 = arith.constant 0 : i32
    return %c0_i32, %c0_i32_0 : i32, i32
  }
  func.func @transform_8(%arg0: i32) -> (i32, i32) {
    %c0_i32 = arith.constant 0 : i32
    %c0_i32_0 = arith.constant 0 : i32
    %c0_i32_1 = arith.constant 0 : i32
    return %c0_i32, %c0_i32_0 : i32, i32
  }
  func.func @transform_9(%arg0: i32) -> (i32, i32) {
    %c0_i32 = arith.constant 0 : i32
    %c0_i32_0 = arith.constant 0 : i32
    %c0_i32_1 = arith.constant 0 : i32
    return %c0_i32, %c0_i32_0 : i32, i32
  }
  func.func @transform_10(%arg0: i32) -> (i32, i32) {
    %c0_i32 = arith.constant 0 : i32
    %c0_i32_0 = arith.constant 0 : i32
    %c0_i32_1 = arith.constant 0 : i32
    return %c0_i32, %c0_i32_0 : i32, i32
  }
  func.func @transform_11(%arg0: i32) -> (i32, i32) {
    %c0_i32 = arith.constant 0 : i32
    %c0_i32_0 = arith.constant 0 : i32
    return %arg0, %c0_i32 : i32, i32
  }
}

module attributes {stable_mosaic.version = 11 : i64} {
  func.func @_actor_kernel(%arg0: i32, %arg1: memref<8x16xf32, #tpu.memory_space<vmem>>, %arg2: memref<16x128xf32, #tpu.memory_space<vmem>>, %arg3: memref<1x128xf32, #tpu.memory_space<vmem>>, %arg4: memref<128x128xf32, #tpu.memory_space<vmem>>, %arg5: memref<1x128xf32, #tpu.memory_space<vmem>>, %arg6: memref<128x128xf32, #tpu.memory_space<vmem>>, %arg7: memref<1x128xf32, #tpu.memory_space<vmem>>, %arg8: memref<128x4xf32, #tpu.memory_space<vmem>>, %arg9: memref<1x4xf32, #tpu.memory_space<vmem>>, %arg10: memref<1x4xf32, #tpu.memory_space<vmem>>, %arg11: memref<1x4xf32, #tpu.memory_space<vmem>>, %arg12: memref<8x4xf32, #tpu.memory_space<vmem>>) attributes {dimension_semantics = [#tpu.dimension_semantics<parallel>], iteration_bounds = array<i64: 1>, scalar_prefetch = 0 : i64, scratch_operands = 0 : i64, tpu.core_type = #tpu.core_type<tc>, window_params = [{transform_indices = @transform_0, window_bounds = array<i64: 8, 16>}, {pipeline_mode = #tpu.pipeline_mode<synchronous>, transform_indices = @transform_1, window_bounds = array<i64: 16, 128>}, {pipeline_mode = #tpu.pipeline_mode<synchronous>, transform_indices = @transform_2, window_bounds = array<i64: 1, 128>}, {pipeline_mode = #tpu.pipeline_mode<synchronous>, transform_indices = @transform_3, window_bounds = array<i64: 128, 128>}, {pipeline_mode = #tpu.pipeline_mode<synchronous>, transform_indices = @transform_4, window_bounds = array<i64: 1, 128>}, {pipeline_mode = #tpu.pipeline_mode<synchronous>, transform_indices = @transform_5, window_bounds = array<i64: 128, 128>}, {pipeline_mode = #tpu.pipeline_mode<synchronous>, transform_indices = @transform_6, window_bounds = array<i64: 1, 128>}, {pipeline_mode = #tpu.pipeline_mode<synchronous>, transform_indices = @transform_7, window_bounds = array<i64: 128, 4>}, {pipeline_mode = #tpu.pipeline_mode<synchronous>, transform_indices = @transform_8, window_bounds = array<i64: 1, 4>}, {pipeline_mode = #tpu.pipeline_mode<synchronous>, transform_indices = @transform_9, window_bounds = array<i64: 1, 4>}, {pipeline_mode = #tpu.pipeline_mode<synchronous>, transform_indices = @transform_10, window_bounds = array<i64: 1, 4>}, {transform_indices = @transform_11, window_bounds = array<i64: 8, 4>}]} {
    %c0 = arith.constant 0 : index
    %c0_0 = arith.constant 0 : index
    %0 = vector.load %arg1[%c0, %c0_0] : memref<8x16xf32, #tpu.memory_space<vmem>>, vector<8x16xf32>
    %c0_1 = arith.constant 0 : index
    %c0_2 = arith.constant 0 : index
    %1 = vector.load %arg2[%c0_1, %c0_2] : memref<16x128xf32, #tpu.memory_space<vmem>>, vector<16x128xf32>
    %cst = arith.constant dense<0.000000e+00> : vector<8x128xf32>
    %2 = tpu.matmul %0, %1, %cst {dimension_numbers = #tpu.dot_dimension_numbers<[1], [0], [0], [1], [0, 0, 1, 1], [], []>} : vector<8x16xf32>, vector<16x128xf32>, vector<8x128xf32> -> vector<8x128xf32>
    %c0_3 = arith.constant 0 : index
    %c0_4 = arith.constant 0 : index
    %3 = vector.load %arg3[%c0_3, %c0_4] : memref<1x128xf32, #tpu.memory_space<vmem>>, vector<1x128xf32>
    %4 = vector.broadcast %3 : vector<1x128xf32> to vector<8x128xf32>
    %5 = arith.addf %2, %4 : vector<8x128xf32>
    %6 = math.sin %5 : vector<8x128xf32>
    %c0_5 = arith.constant 0 : index
    %c0_6 = arith.constant 0 : index
    %7 = vector.load %arg4[%c0_5, %c0_6] : memref<128x128xf32, #tpu.memory_space<vmem>>, vector<128x128xf32>
    %c0_7 = arith.constant 0 : index
    %c0_8 = arith.constant 0 : index
    %8 = vector.load %arg5[%c0_7, %c0_8] : memref<1x128xf32, #tpu.memory_space<vmem>>, vector<1x128xf32>
    %cst_9 = arith.constant dense<0.000000e+00> : vector<8x128xf32>
    %9 = tpu.matmul %6, %7, %cst_9 {dimension_numbers = #tpu.dot_dimension_numbers<[1], [0], [0], [1], [0, 0, 1, 1], [], []>} : vector<8x128xf32>, vector<128x128xf32>, vector<8x128xf32> -> vector<8x128xf32>
    %10 = vector.broadcast %8 : vector<1x128xf32> to vector<8x128xf32>
    %11 = arith.addf %9, %10 : vector<8x128xf32>
    %cst_10 = arith.constant 0.000000e+00 : f32
    %12 = vector.broadcast %cst_10 : f32 to vector<8x128xf32>
    %13 = arith.maximumf %11, %12 : vector<8x128xf32>
    %c0_11 = arith.constant 0 : index
    %c0_12 = arith.constant 0 : index
    %14 = vector.load %arg6[%c0_11, %c0_12] : memref<128x128xf32, #tpu.memory_space<vmem>>, vector<128x128xf32>
    %c0_13 = arith.constant 0 : index
    %c0_14 = arith.constant 0 : index
    %15 = vector.load %arg7[%c0_13, %c0_14] : memref<1x128xf32, #tpu.memory_space<vmem>>, vector<1x128xf32>
    %cst_15 = arith.constant dense<0.000000e+00> : vector<8x128xf32>
    %16 = tpu.matmul %13, %14, %cst_15 {dimension_numbers = #tpu.dot_dimension_numbers<[1], [0], [0], [1], [0, 0, 1, 1], [], []>} : vector<8x128xf32>, vector<128x128xf32>, vector<8x128xf32> -> vector<8x128xf32>
    %17 = vector.broadcast %15 : vector<1x128xf32> to vector<8x128xf32>
    %18 = arith.addf %16, %17 : vector<8x128xf32>
    %cst_16 = arith.constant 0.000000e+00 : f32
    %19 = vector.broadcast %cst_16 : f32 to vector<8x128xf32>
    %20 = arith.maximumf %18, %19 : vector<8x128xf32>
    %c0_17 = arith.constant 0 : index
    %c0_18 = arith.constant 0 : index
    %21 = vector.load %arg8[%c0_17, %c0_18] : memref<128x4xf32, #tpu.memory_space<vmem>>, vector<128x4xf32>
    %c0_19 = arith.constant 0 : index
    %c0_20 = arith.constant 0 : index
    %22 = vector.load %arg9[%c0_19, %c0_20] : memref<1x4xf32, #tpu.memory_space<vmem>>, vector<1x4xf32>
    %cst_21 = arith.constant dense<0.000000e+00> : vector<8x4xf32>
    %23 = tpu.matmul %20, %21, %cst_21 {dimension_numbers = #tpu.dot_dimension_numbers<[1], [0], [0], [1], [0, 0, 1, 1], [], []>} : vector<8x128xf32>, vector<128x4xf32>, vector<8x4xf32> -> vector<8x4xf32>
    %24 = vector.broadcast %22 : vector<1x4xf32> to vector<8x4xf32>
    %25 = arith.addf %23, %24 : vector<8x4xf32>
    %26 = math.tanh %25 : vector<8x4xf32>
    %c0_22 = arith.constant 0 : index
    %c0_23 = arith.constant 0 : index
    %27 = vector.load %arg10[%c0_22, %c0_23] : memref<1x4xf32, #tpu.memory_space<vmem>>, vector<1x4xf32>
    %28 = vector.broadcast %27 : vector<1x4xf32> to vector<8x4xf32>
    %29 = arith.mulf %26, %28 : vector<8x4xf32>
    %c0_24 = arith.constant 0 : index
    %c0_25 = arith.constant 0 : index
    %30 = vector.load %arg11[%c0_24, %c0_25] : memref<1x4xf32, #tpu.memory_space<vmem>>, vector<1x4xf32>
    %31 = vector.broadcast %30 : vector<1x4xf32> to vector<8x4xf32>
    %32 = arith.addf %29, %31 : vector<8x4xf32>
    %c0_26 = arith.constant 0 : index
    %c0_27 = arith.constant 0 : index
    %33 = vector.load %arg12[%c0_26, %c0_27] : memref<8x4xf32, #tpu.memory_space<vmem>>, vector<8x4xf32>
    tpu.vector_store %arg12[%c0_26, %c0_27], %32 {strides = array<i32>} : memref<8x4xf32, #tpu.memory_space<vmem>>, vector<8x4xf32>,
    return
  }
  func.func @transform_0(%arg0: i32) -> (i32, i32) {
    %c0_i32 = arith.constant 0 : i32
    %c0_i32_0 = arith.constant 0 : i32
    return %arg0, %c0_i32 : i32, i32
  }
  func.func @transform_1(%arg0: i32) -> (i32, i32) {
    %c0_i32 = arith.constant 0 : i32
    %c0_i32_0 = arith.constant 0 : i32
    %c0_i32_1 = arith.constant 0 : i32
    return %c0_i32, %c0_i32_0 : i32, i32
  }
  func.func @transform_2(%arg0: i32) -> (i32, i32) {
    %c0_i32 = arith.constant 0 : i32
    %c0_i32_0 = arith.constant 0 : i32
    %c0_i32_1 = arith.constant 0 : i32
    return %c0_i32, %c0_i32_0 : i32, i32
  }
  func.func @transform_3(%arg0: i32) -> (i32, i32) {
    %c0_i32 = arith.constant 0 : i32
    %c0_i32_0 = arith.constant 0 : i32
    %c0_i32_1 = arith.constant 0 : i32
    return %c0_i32, %c0_i32_0 : i32, i32
  }
  func.func @transform_4(%arg0: i32) -> (i32, i32) {
    %c0_i32 = arith.constant 0 : i32
    %c0_i32_0 = arith.constant 0 : i32
    %c0_i32_1 = arith.constant 0 : i32
    return %c0_i32, %c0_i32_0 : i32, i32
  }
  func.func @transform_5(%arg0: i32) -> (i32, i32) {
    %c0_i32 = arith.constant 0 : i32
    %c0_i32_0 = arith.constant 0 : i32
    %c0_i32_1 = arith.constant 0 : i32
    return %c0_i32, %c0_i32_0 : i32, i32
  }
  func.func @transform_6(%arg0: i32) -> (i32, i32) {
    %c0_i32 = arith.constant 0 : i32
    %c0_i32_0 = arith.constant 0 : i32
    %c0_i32_1 = arith.constant 0 : i32
    return %c0_i32, %c0_i32_0 : i32, i32
  }
  func.func @transform_7(%arg0: i32) -> (i32, i32) {
    %c0_i32 = arith.constant 0 : i32
    %c0_i32_0 = arith.constant 0 : i32
    %c0_i32_1 = arith.constant 0 : i32
    return %c0_i32, %c0_i32_0 : i32, i32
  }
  func.func @transform_8(%arg0: i32) -> (i32, i32) {
    %c0_i32 = arith.constant 0 : i32
    %c0_i32_0 = arith.constant 0 : i32
    %c0_i32_1 = arith.constant 0 : i32
    return %c0_i32, %c0_i32_0 : i32, i32
  }
  func.func @transform_9(%arg0: i32) -> (i32, i32) {
    %c0_i32 = arith.constant 0 : i32
    %c0_i32_0 = arith.constant 0 : i32
    %c0_i32_1 = arith.constant 0 : i32
    return %c0_i32, %c0_i32_0 : i32, i32
  }
  func.func @transform_10(%arg0: i32) -> (i32, i32) {
    %c0_i32 = arith.constant 0 : i32
    %c0_i32_0 = arith.constant 0 : i32
    %c0_i32_1 = arith.constant 0 : i32
    return %c0_i32, %c0_i32_0 : i32, i32
  }
  func.func @transform_11(%arg0: i32) -> (i32, i32) {
    %c0_i32 = arith.constant 0 : i32
    %c0_i32_0 = arith.constant 0 : i32
    return %arg0, %c0_i32 : i32, i32
  }
}

</mosaic_0001>

<bundles_post_ra>
// kernel: tpu_custom_call.1
= control target key start
LH: loop header
LB: loop body
LE: loop exit
PB: predicated region body
PF: predicated region fallthrough
CT: control target
= control target key end

     0   :  { %16 = vsyncpa [#allocation3], 0  ;;  %s1113_s0 = inlined_call_operand.vmem [shape: f32[8,16], index: 0, kind: input, shape index: {}]   ;;  %s1114_s1 = inlined_call_operand.hbm [shape: f32[16,128], index: 1, kind: input, shape index: {}]   ;;  %s1115_s2 = inlined_call_operand.vmem [shape: f32[1,128], index: 2, kind: input, shape index: {}]   ;;  %s1116_s3 = inlined_call_operand.vmem [shape: f32[128,128], index: 3, kind: input, shape index: {}]   ;;  %s1117_s4 = inlined_call_operand.hbm [shape: f32[1,128], index: 4, kind: input, shape index: {}]   ;;  %s1118_s5 = inlined_call_operand.hbm [shape: f32[128,128], index: 5, kind: input, shape index: {}]   ;;  %s1119_s6 = inlined_call_operand.vmem [shape: f32[1,128], index: 6, kind: input, shape index: {}]   ;;  %s1120_s7 = inlined_call_operand.vmem [shape: f32[128,4], index: 7, kind: input, shape index: {}]   ;;  %s1121_s8 = inlined_call_operand.vmem [shape: f32[1,4], index: 8, kind: input, shape index: {}]   ;;  %s1122_s9 = inlined_call_operand.vmem [shape: f32[1,4], index: 9, kind: input, shape index: {}]   ;;  %s1123_s10 = inlined_call_operand.vmem [shape: f32[1,4], index: 10, kind: input, shape index: {}]   ;;  %s1124_s11 = inlined_call_operand.vmem [shape: f32[8,4], index: 11, kind: output, shape index: {}]  }
   0x1   :  { %17 = vsyncpa [#allocation5], 0  ;;  %s835_s17 = smov [#allocation4]   ;;  %s836_s19 = smov [#allocation2]  }
   0x2   :  { %s42_s18 = sshll.u32 %s835_s17, 4  ;;  %s25_s20 = sshll.u32 %s836_s19, 4  ;;  %s43_s18 = int_to_ptr.vmem [resolvable:$true] %s42_s18  ;;  %s26_s20 = int_to_ptr.vmem [resolvable:$true] %s25_s20 }
   0x3   :  { %s779_s21 = scalar_lea.vmem %s43_s18, 16  ;;  %s783_s22 = scalar_lea.vmem %s43_s18, 32 }
   0x4   :  { %p780_p0 = scmp.ne.s32.totalorder %s43_s18, %s779_s21  ;;  %p784_p1 = scmp.lt.s32.totalorder %s43_s18, %s43_s18 }
   0x5   :  { %p785_p2 = scmp.lt.s32.totalorder %s783_s22, %s779_s21 }
   0x7   :  { %p786_p3 = por %p785_p2, %p784_p1 }
   0x9   :  { %p787_p4 = pnand %p786_p3, %p780_p0 }
   0xb   :  { %790 = shalt.err (!%p787_p4)
}
   0xc   :  { %45 = dma.hbm_to_vmem [thread:$0]  %s1117_s4, 16, %s43_s18, [#allocation5]  }
   0xd   :  { %s799_s25 = scalar_lea.vmem %s26_s20, 256  ;;  %p804_p6 = scmp.lt.s32.totalorder %s26_s20, %s26_s20 }
   0xe   :  { %p800_p5 = scmp.ne.s32.totalorder %s26_s20, %s799_s25  ;;  %p805_p7 = scmp.lt.s32.totalorder %s799_s25, %s799_s25 }
  0x10   :  { %p806_p8 = por %p805_p7, %p804_p6 }
  0x12   :  { %p807_p9 = pnand %p806_p8, %p800_p5 }
  0x14   :  { %810 = shalt.err (!%p807_p9)
}
  0x15   :  { %s837_s26 = smov 128   ;;  %s838_s27 = smov 8  }
  0x16   :  { %31 = dma.hbm_to_vmem [thread:$0]  %s1114_s1, 256, %s26_s20, [#allocation3], %s837_s26, %s837_s26, %s838_s27  }
  0x17   :  { %s839_s30 = smov [#allocation6]  }
  0x18   :  { %s51_s12 = sshll.u32 %s839_s30, 4  ;;  %s52_s12 = int_to_ptr.vmem [resolvable:$true] %s51_s12 }
  0x19   :  { %s819_s13 = scalar_lea.vmem %s52_s12, 2048  ;;  %p824_p11 = scmp.lt.s32.totalorder %s52_s12, %s52_s12 }
  0x1a   :  { %p820_p10 = scmp.ne.s32.totalorder %s52_s12, %s819_s13  ;;  %p825_p12 = scmp.lt.s32.totalorder %s819_s13, %s819_s13 }
  0x1c   :  { %p826_p13 = por %p825_p12, %p824_p11 }
  0x1e   :  { %p827_p0 = pnand %p826_p13, %p820_p10 }
  0x20   :  { %830 = shalt.err (!%p827_p0)
}
  0x21   :  { %57 = dma.hbm_to_vmem [thread:$0]  %s1118_s5, 2048, %s52_s12, [#allocation5], %s837_s26, %s837_s26, %s838_s27  }
  0x22   :  { %831 = dma.done.wait [#allocation3], 256  }
  0x23   :  { %832 = vsyncadd [#allocation3], 4294967040 }
  0x24   :  { %833 = dma.done.wait [#allocation5], 2064  }
  0x25   :  { %834 = vsyncadd [#allocation5], 4294965232  ;;  %v840_v0 = vmov 0.0   ;;  %vm841_vm0 = vmmov 0   ;;  %v79_v1 = vld [vmem:[#allocation2 + $0x8] sm:$0xff]  ;;  %v78_v2 = vld [vmem:[#allocation2] sm:$0xff] }
  0x26   :  { %636 = vmatprep.subr.mxu0 %v840_v0  ;;  %640 = vmatprep.mubr.msk.f32.mxu0 %vm841_vm0, %v840_v0  ;;  %v77_v3 = vld [vmem:[%s1113_s0] sm:$0xff]  ;;  %vm87_vm1 = vcmask 130048   ;;  %v280_v4 = vld [vmem:[%s1116_s3 + $0x78] sm:$0xff]  ;;  %v279_v5 = vld [vmem:[%s1116_s3 + $0x70] sm:$0xff]  ;;  %v842_v47 = vmov 683565275  }
  0x27   :  { %643 = vmatprep.subr.mxu1 %v840_v0  ;;  %675 = vmatprep.mubr.msk.f32.mxu1 %vm841_vm0, %v840_v0  ;;  %v278_v6 = vld [vmem:[%s1116_s3 + $0x68] sm:$0xff]  ;;  %v277_v7 = vld [vmem:[%s1116_s3 + $0x60] sm:$0xff]  ;;  %v276_v8 = vld [vmem:[%s1116_s3 + $0x58] sm:$0xff]  ;;  %v843_v49 = vmov 2475754826   ;;  %vm563_vm15 = vcmask 31744  }
  0x28   :  { %637 = vmatpush3.msra.mxu0 %v79_v1  ;;  %644 = vmatpush3.msra.mxu1 %v280_v4  ;;  %v275_v9 = vld [vmem:[%s1116_s3 + $0x50] sm:$0xff]  ;;  %v274_v10 = vld [vmem:[%s1116_s3 + $0x48] sm:$0xff]  ;;  %v273_v11 = vld [vmem:[%s1116_s3 + $0x40] sm:$0xff]  ;;  %v844_v52 = vmov 2131351028  }
  0x29   :  { %638 = vmatprep.subr.mxu0 %v840_v0  ;;  %645 = vmatprep.subr.mxu1 %v840_v0  ;;  %v272_v12 = vld [vmem:[%s1116_s3 + $0x38] sm:$0xff]  ;;  %v271_v13 = vld [vmem:[%s1116_s3 + $0x30] sm:$0xff]  ;;  %v270_v14 = vld [vmem:[%s1116_s3 + $0x28] sm:$0xff]  ;;  %v845_v55 = vmov 2102212464  }
  0x2a   :  { %639 = vmatpush3.msra.mxu0 %v78_v2  ;;  %646 = vmatpush3.msra.mxu1 %v279_v5  ;;  %v269_v15 = vld [vmem:[%s1116_s3 + $0x20] sm:$0xff]  ;;  %v268_v16 = vld [vmem:[%s1116_s3 + $0x18] sm:$0xff]  ;;  %v267_v17 = vld [vmem:[%s1116_s3 + $0x10] sm:$0xff]  ;;  %v846_v58 = vmov 920167782  }
  0x2b   :  { %641 = vmatmul.mubr.msk.f32.vlgmr.msra.gmra.mxu0 %vm87_vm1, %v77_v3  ;;  %678 = vmatprep.subr.mxu0 %v840_v0  ;;  %v266_v18 = vld [vmem:[%s1116_s3 + $0x8] sm:$0xff]  ;;  %v265_v19 = vld [vmem:[%s1116_s3] sm:$0xff]  ;;  %v371_v23 = vld [vmem:[#allocation6 + $0x60] sm:$0xff]  ;;  %v847_v61 = vmov 1326507024  }
  0x2c   :  { %710 = vmatprep.mubr.msk.f32.mxu0 %vm841_vm0, %v840_v0  ;;  %647 = vmatprep.subr.mxu1 %v840_v0  ;;  %v374_v20 = vld [vmem:[#allocation6 + $0x78] sm:$0xff]  ;;  %v373_v21 = vld [vmem:[#allocation6 + $0x70] sm:$0xff]  ;;  %v372_v22 = vld [vmem:[#allocation6 + $0x68] sm:$0xff] }
  0x2d   :  { %648 = vmatpush3.msra.mxu1 %v278_v6  ;;  %679 = vmatpush3.msra.mxu0 %v374_v20  ;;  %v370_v24 = vld [vmem:[#allocation6 + $0x58] sm:$0xff]  ;;  %v369_v25 = vld [vmem:[#allocation6 + $0x50] sm:$0xff]  ;;  %v368_v26 = vld [vmem:[#allocation6 + $0x48] sm:$0xff] }
  0x2e   :  { %649 = vmatprep.subr.mxu1 %v840_v0  ;;  %680 = vmatprep.subr.mxu0 %v840_v0  ;;  %v367_v27 = vld [vmem:[#allocation6 + $0x40] sm:$0xff]  ;;  %v366_v28 = vld [vmem:[#allocation6 + $0x38] sm:$0xff]  ;;  %v365_v29 = vld [vmem:[#allocation6 + $0x30] sm:$0xff] }
  0x2f   :  { %650 = vmatpush3.msra.mxu1 %v277_v7  ;;  %681 = vmatpush3.msra.mxu0 %v373_v21  ;;  %v364_v30 = vld [vmem:[#allocation6 + $0x28] sm:$0xff]  ;;  %v363_v31 = vld [vmem:[#allocation6 + $0x20] sm:$0xff]  ;;  %v362_v32 = vld [vmem:[#allocation6 + $0x18] sm:$0xff] }
  0x30   :  { %651 = vmatprep.subr.mxu1 %v840_v0  ;;  %682 = vmatprep.subr.mxu0 %v840_v0  ;;  %v571_v33 = vld [vmem:[%s1115_s2] ss:$0 sm:$0xff] }
  0x31   :  { %652 = vmatpush3.msra.mxu1 %v276_v8  ;;  %683 = vmatpush3.msra.mxu0 %v372_v22 }
  0x32   :  { %653 = vmatprep.subr.mxu1 %v840_v0  ;;  %684 = vmatprep.subr.mxu0 %v840_v0 }
  0x33   :  { %654 = vmatpush3.msra.mxu1 %v275_v9  ;;  %685 = vmatpush3.msra.mxu0 %v371_v23 }
  0x34   :  { %655 = vmatprep.subr.mxu1 %v840_v0  ;;  %686 = vmatprep.subr.mxu0 %v840_v0 }
  0x35   :  { %656 = vmatpush3.msra.mxu1 %v274_v10  ;;  %687 = vmatpush3.msra.mxu0 %v370_v24 }
  0x36   :  { %657 = vmatprep.subr.mxu1 %v840_v0  ;;  %688 = vmatprep.subr.mxu0 %v840_v0 }
  0x37   :  { %658 = vmatpush3.msra.mxu1 %v273_v11  ;;  %689 = vmatpush3.msra.mxu0 %v369_v25 }
  0x38   :  { %659 = vmatprep.subr.mxu1 %v840_v0  ;;  %690 = vmatprep.subr.mxu0 %v840_v0 }
  0x39   :  { %660 = vmatpush3.msra.mxu1 %v272_v12  ;;  %691 = vmatpush3.msra.mxu0 %v368_v26 }
  0x3a   :  { %661 = vmatprep.subr.mxu1 %v840_v0  ;;  %692 = vmatprep.subr.mxu0 %v840_v0 }
  0x3b   :  { %662 = vmatpush3.msra.mxu1 %v271_v13  ;;  %693 = vmatpush3.msra.mxu0 %v367_v27 }
  0x3c   :  { %663 = vmatprep.subr.mxu1 %v840_v0  ;;  %694 = vmatprep.subr.mxu0 %v840_v0 }
  0x3d   :  { %664 = vmatpush3.msra.mxu1 %v270_v14  ;;  %695 = vmatpush3.msra.mxu0 %v366_v28 }
  0x3e   :  { %665 = vmatprep.subr.mxu1 %v840_v0  ;;  %696 = vmatprep.subr.mxu0 %v840_v0 }
  0x3f   :  { %666 = vmatpush3.msra.mxu1 %v269_v15  ;;  %697 = vmatpush3.msra.mxu0 %v365_v29 }
  0x40   :  { %667 = vmatprep.subr.mxu1 %v840_v0  ;;  %698 = vmatprep.subr.mxu0 %v840_v0 }
  0x41   :  { %668 = vmatpush3.msra.mxu1 %v268_v16  ;;  %699 = vmatpush3.msra.mxu0 %v364_v30 }
  0x42   :  { %669 = vmatprep.subr.mxu1 %v840_v0  ;;  %700 = vmatprep.subr.mxu0 %v840_v0 }
  0x43   :  { %670 = vmatpush3.msra.mxu1 %v267_v17  ;;  %701 = vmatpush3.msra.mxu0 %v363_v31 }
  0x44   :  { %671 = vmatprep.subr.mxu1 %v840_v0  ;;  %702 = vmatprep.subr.mxu0 %v840_v0 }
  0x45   :  { %672 = vmatpush3.msra.mxu1 %v266_v18  ;;  %703 = vmatpush3.msra.mxu0 %v362_v32 }
  0x46   :  { %673 = vmatprep.subr.mxu1 %v840_v0  ;;  %704 = vmatprep.subr.mxu0 %v840_v0 }
  0x47   :  { %674 = vmatpush3.msra.mxu1 %v265_v19 }
  0x48   :  { %713 = vmatprep.subr.mxu1 %v840_v0 }
  0xeb   :  { %v157_v34 = vpop.f32.mrf.mxu0 }
  0xec   :  { %v1010_v35 = vadd.f32 %v571_v33, %v157_v34 }
  0xed   :  { %v642_v36 = vpop.f32.mrf.mxu0 }
  0xee   :  { %v164_v37 = vand.u32 2139095040, %v1010_v35  ;;  %v161_v41 = vand.u32 2147483647, %v1010_v35  ;;  %vm163_vm9 = vcmp.lt.s32.totalorder %v1010_v35, 0  ;;  %vm253_vm14 = vweird.f32 %v1010_v35 }
  0xf0   :  { %v165_v38 = vshrl.u32 %v164_v37, 23  ;;  %v168_v44 = vand.u32 8388607, %v161_v41  ;;  %vm162_vm10 = vcmp.le.f32.partialorder %v161_v41, 0.7853982 }
  0xf2   :  { %v573_v39 = vadd.s32 4294967169, %v165_v38  ;;  %v169_v63 = vor.u32 8388608, %v168_v44 }
  0xf4   :  { %v171_v40 = vadd.s32 1, %v573_v39  ;;  %v209_v14 = vshll.u32 %v169_v63, 8 }
  0xf6   :  { %vm172_vm2 = vcmp.gt.s32.totalorder %v171_v40, 0 }
  0xf7   :  { %v173_v42 = vsel %vm172_vm2, %v171_v40, 0 }
  0xf8   :  { %v175_v43 = vand.u32 31, %v173_v42  ;;  %v174_v46 = vshrl.u32 %v173_v42, 5 }
  0xfa   :  { %v176_v45 = vsub.s32 32, %v175_v43  ;;  %v178_v48 = vshll.u32 %v842_v47, %v175_v43  ;;  %v181_v50 = vshll.u32 %v843_v49, %v175_v43  ;;  %v184_v54 = vshll.u32 %v844_v52, %v175_v43 }
  0xfb   :  { %v187_v57 = vshll.u32 %v845_v55, %v175_v43  ;;  %v190_v60 = vshll.u32 %v846_v58, %v175_v43  ;;  %vm193_vm3 = vcmp.lt.s32.totalorder %v174_v46, 1  ;;  %vm196_vm4 = vcmp.lt.s32.totalorder %v174_v46, 4 }
  0xfc   :  { %v179_v51 = vshrl.u32 %v843_v49, %v176_v45  ;;  %v182_v53 = vshrl.u32 %v844_v52, %v176_v45  ;;  %v185_v56 = vshrl.u32 %v845_v55, %v176_v45  ;;  %v188_v59 = vshrl.u32 %v846_v58, %v176_v45 }
  0xfd   :  { %v191_v62 = vshrl.u32 %v847_v61, %v176_v45  ;;  %v177_v9 = vshrl.u32 %v842_v47, %v176_v45  ;;  %vm195_vm5 = vcmp.lt.s32.totalorder %v174_v46, 3  ;;  %vm194_vm6 = vcmp.lt.s32.totalorder %v174_v46, 2 }
  0xfe   :  { %v180_v1 = vor.u32 %v179_v51, %v178_v48  ;;  %v183_v2 = vor.u32 %v182_v53, %v181_v50  ;;  %v186_v3 = vor.u32 %v185_v56, %v184_v54  ;;  %v189_v4 = vor.u32 %v188_v59, %v187_v57 }
  0xff   :  { %v192_v5 = vor.u32 %v191_v62, %v190_v60 }
 0x100   :  { %v198_v6 = vsel %vm196_vm4, %v186_v3, 2102212464  ;;  %v201_v7 = vsel %vm193_vm3, %v180_v1, %v183_v2  ;;  %v205_v8 = vsel %vm193_vm3, %v183_v2, %v186_v3  ;;  %v202_v10 = vsel %vm196_vm4, %v189_v4, 920167782 }
 0x101   :  { %v206_v11 = vsel %vm196_vm4, %v192_v5, 1326507024  ;;  %v203_v12 = vsel %vm195_vm5, %v186_v3, %v202_v10  ;;  %v197_v15 = vsel %vm193_vm3, %v177_v9, %v180_v1  ;;  %v199_v16 = vsel %vm195_vm5, %v183_v2, %v198_v6  ;;  %v361_v3 = vld [vmem:[#allocation6 + $0x10] sm:$0xff]  ;;  %v359_v5 = vld [vmem:[#allocation6] sm:$0xff] }
 0x102   :  { %v207_v13 = vsel %vm195_vm5, %v189_v4, %v206_v11  ;;  %v204_v17 = vsel %vm194_vm6, %v201_v7, %v203_v12  ;;  %v200_v23 = vsel %vm194_vm6, %v197_v15, %v199_v16  ;;  %705 = vmatpush3.msra.mxu0 %v361_v3  ;;  %v360_v4 = vld [vmem:[#allocation6 + $0x8] sm:$0xff]  ;;  %v467_v6 = vld [vmem:[%s1120_s7 + $0x70] sm:$0xff]  ;;  %v466_v7 = vld [vmem:[%s1120_s7 + $0x68] sm:$0xff] }
 0x103   :  { %v208_v18 = vsel %vm194_vm6, %v205_v8, %v207_v13  ;;  %v1019_v21 = vmul.u32.u64.low %v209_v14, %v204_v17  ;;  %v1020_v22 = vmul.u32.u64.high %v209_v14, %v204_v17, %v1019_v21  ;;  %v216_v25 = vmul.u32 %v209_v14, %v200_v23  ;;  %706 = vmatprep.subr.mxu0 %v840_v0  ;;  %v465_v8 = vld [vmem:[%s1120_s7 + $0x60] sm:$0xff]  ;;  %v464_v9 = vld [vmem:[%s1120_s7 + $0x58] sm:$0xff]  ;;  %v463_v10 = vld [vmem:[%s1120_s7 + $0x50] sm:$0xff] }
 0x104   :  { %v1016_v19 = vmul.u32.u64.low %v209_v14, %v208_v18  ;;  %v1017_v20 = vmul.u32.u64.high %v209_v14, %v208_v18, %v1016_v19  ;;  %707 = vmatpush3.msra.mxu0 %v360_v4  ;;  %v462_v11 = vld [vmem:[%s1120_s7 + $0x48] sm:$0xff]  ;;  %v461_v12 = vld [vmem:[%s1120_s7 + $0x40] sm:$0xff]  ;;  %v460_v13 = vld [vmem:[%s1120_s7 + $0x38] sm:$0xff] }
 0x105   :  { %v219_v24 = vadd.s32 1, %v1020_v22  ;;  %708 = vmatprep.subr.mxu0 %v840_v0  ;;  %v459_v14 = vld [vmem:[%s1120_s7 + $0x30] sm:$0xff]  ;;  %v458_v15 = vld [vmem:[%s1120_s7 + $0x28] sm:$0xff]  ;;  %v457_v16 = vld [vmem:[%s1120_s7 + $0x20] sm:$0xff] }
 0x106   :  { %vm218_vm7 = vc.u32 %v1017_v20, %v1019_v21  ;;  %v217_v38 = vadd.s32 %v1019_v21, %v1017_v20  ;;  %709 = vmatpush3.msra.mxu0 %v359_v5  ;;  %v456_v17 = vld [vmem:[%s1120_s7 + $0x18] sm:$0xff]  ;;  %v577_v18 = vld [vmem:[#allocation4] ss:$0 sm:$0xff] }
 0x107   :  { %v220_v26 = vsel %vm218_vm7, %v219_v24, %v1020_v22  ;;  %v455_v23 = vld [vmem:[%s1120_s7 + $0x10] sm:$0xff]  ;;  %v454_v24 = vld [vmem:[%s1120_s7 + $0x8] sm:$0xff] }
 0x108   :  { %v221_v27 = vadd.s32 %v220_v26, %v216_v25  ;;  %v453_v25 = vld [vmem:[%s1120_s7] sm:$0xff] }
 0x109   :  { %v578_v26 = vld [vmem:[%s1119_s6] ss:$0 sm:$0xff] }
 0x10a   :  { %v222_v28 = vadd.s32 536870912, %v221_v27 }
 0x10c   :  { %v223_v29 = vshrl.u32 %v222_v28, 30 }
 0x10e   :  { %v224_v30 = vshll.u32 %v223_v29, 30  ;;  %v247_v52 = vsub.s32 4, %v223_v29 }
 0x110   :  { %v225_v31 = vsub.s32 %v221_v27, %v224_v30  ;;  %v248_v55 = vsel %vm163_vm9, %v247_v52, %v223_v29 }
 0x111   :  { %v250_v56 = vsel %vm162_vm10, 0, %v248_v55 }
 0x112   :  { %v227_v32 = vsub.s32 0, %v225_v31  ;;  %v254_v57 = vadd.s32 3, %v250_v56 }
 0x114   :  { %v574_v33 = vmin.u32 %v227_v32, %v225_v31  ;;  %v255_v58 = vand.u32 3, %v254_v57 }
 0x116   :  { %v229_v34 = vclz %v574_v33  ;;  %vm260_vm11 = vcmp.eq.s32.totalorder %v255_v58, 2  ;;  %vm257_vm12 = vcmp.eq.s32.totalorder %v255_v58, 0  ;;  %vm256_vm13 = vcmp.lt.s32.totalorder %v255_v58, 2 }
 0x118   :  { %v575_v36 = vadd.s32 4294967294, %v229_v34 }
 0x11a   :  { %vm576_vm8 = vcmp.lt.s32.totalorder %v575_v36, 0 }
 0x11b   :  { %v232_v37 = vsel %vm576_vm8, 0, %v575_v36 }
 0x11c   :  { %v233_v39 = vsub.s32 32, %v232_v37  ;;  %v237_v40 = vsub.s32 4294967266, %v232_v37  ;;  %v234_v42 = vshll.u32 %v225_v31, %v232_v37  ;;  %v579_v31 = vld [vmem:[%s1121_s8] ss:$0 sm:$0xff] }
 0x11d   :  { %v581_v37 = vld [vmem:[%s1123_s10] ss:$0 sm:$0xff] }
 0x11e   :  { %v235_v43 = vshrl.u32 %v217_v38, %v233_v39  ;;  %v238_v44 = vadd.s32 127, %v237_v40 }
 0x120   :  { %v236_v45 = vor.u32 %v235_v43, %v234_v42  ;;  %v239_v46 = vshll.u32 %v238_v44, 23 }
 0x122   :  { %v240_v47 = vor.u32 4788187, %v239_v46  ;;  %v243_v49 = vcvt.s32.f32 %v236_v45 }
 0x124   :  { %v241_v48 = vand.u32 2147483647, %v240_v47 }
 0x126   :  { %v244_v50 = vmul.f32 %v243_v49, %v241_v48 }
 0x128   :  { %v245_v51 = vxor.u32 2147483648, %v244_v50 }
 0x12a   :  { %v246_v53 = vsel %vm163_vm9, %v245_v51, %v244_v50 }
 0x12b   :  { %v249_v54 = vsel %vm162_vm10, %v1010_v35, %v246_v53  ;;  %v468_v35 = vld [vmem:[%s1120_s7 + $0x78] sm:$0xff] }
 0x12c   :  { %765 = vcosq.f32 %v249_v54 }
 0x12d   :  { %767 = vsinq.f32 %v249_v54 }
 0x139   :  { %v766_v59 = vpop.eup %765 }
 0x13a   :  { %v768_v60 = vpop.eup %767  ;;  %v261_v61 = vxor.u32 2147483648, %v766_v59 }
 0x13b   :  { %v258_v62 = vxor.u32 2147483648, %v768_v60 }
 0x13c   :  { %v262_v63 = vsel %vm260_vm11, %v261_v61, %v768_v60 }
 0x13d   :  { %v259_v1 = vsel %vm257_vm12, %v766_v59, %v258_v62 }
 0x13e   :  { %v263_v41 = vsel %vm256_vm13, %v259_v1, %v262_v63 }
 0x13f   :  { %v264_v2 = vsel %vm253_vm14, nan, %v263_v41 }
 0x140   :  { %676 = vmatmul.mubr.f32.vlgmr.msra.gmra.mxu1 %v264_v2 }
 0x141   :  { %745 = vmatprep.mubr.msk.f32.mxu1 %vm841_vm0, %v840_v0  ;;  %714 = vmatpush3.msra.mxu1 %v468_v35 }
 0x142   :  { %715 = vmatprep.subr.mxu1 %v840_v0 }
 0x143   :  { %716 = vmatpush3.msra.mxu1 %v467_v6 }
 0x144   :  { %717 = vmatprep.subr.mxu1 %v840_v0 }
 0x145   :  { %718 = vmatpush3.msra.mxu1 %v466_v7 }
 0x146   :  { %719 = vmatprep.subr.mxu1 %v840_v0 }
 0x147   :  { %720 = vmatpush3.msra.mxu1 %v465_v8 }
 0x148   :  { %721 = vmatprep.subr.mxu1 %v840_v0 }
 0x149   :  { %722 = vmatpush3.msra.mxu1 %v464_v9 }
 0x14a   :  { %723 = vmatprep.subr.mxu1 %v840_v0 }
 0x14b   :  { %724 = vmatpush3.msra.mxu1 %v463_v10 }
 0x14c   :  { %725 = vmatprep.subr.mxu1 %v840_v0 }
 0x14d   :  { %726 = vmatpush3.msra.mxu1 %v462_v11 }
 0x14e   :  { %727 = vmatprep.subr.mxu1 %v840_v0 }
 0x14f   :  { %728 = vmatpush3.msra.mxu1 %v461_v12 }
 0x150   :  { %729 = vmatprep.subr.mxu1 %v840_v0 }
 0x151   :  { %730 = vmatpush3.msra.mxu1 %v460_v13 }
 0x152   :  { %731 = vmatprep.subr.mxu1 %v840_v0 }
 0x153   :  { %732 = vmatpush3.msra.mxu1 %v459_v14 }
 0x154   :  { %733 = vmatprep.subr.mxu1 %v840_v0 }
 0x155   :  { %734 = vmatpush3.msra.mxu1 %v458_v15 }
 0x156   :  { %735 = vmatprep.subr.mxu1 %v840_v0 }
 0x157   :  { %736 = vmatpush3.msra.mxu1 %v457_v16 }
 0x158   :  { %737 = vmatprep.subr.mxu1 %v840_v0 }
 0x159   :  { %738 = vmatpush3.msra.mxu1 %v456_v17 }
 0x15a   :  { %739 = vmatprep.subr.mxu1 %v840_v0 }
 0x15b   :  { %740 = vmatpush3.msra.mxu1 %v455_v23 }
 0x15c   :  { %741 = vmatprep.subr.mxu1 %v840_v0 }
 0x15d   :  { %742 = vmatpush3.msra.mxu1 %v454_v24 }
 0x15e   :  { %743 = vmatprep.subr.mxu1 %v840_v0  ;;  %v580_v0 = vld [vmem:[%s1122_s9] ss:$0 sm:$0xff] }
 0x15f   :  { %744 = vmatpush3.msra.mxu1 %v453_v25 }
 0x200   :  { %v354_v19 = vpop.f32.mrf.mxu1 }
 0x201   :  { %v355_v20 = vadd.f32 %v577_v18, %v354_v19 }
 0x202   :  { %v677_v21 = vpop.f32.mrf.mxu1 }
 0x203   :  { %v358_v22 = vmax.f32 %v355_v20, 0.0 }
 0x205   :  { %711 = vmatmul.mubr.f32.vlgmr.msra.gmra.mxu0 %v358_v22 }
 0x2c5   :  { %v448_v27 = vpop.f32.mrf.mxu0 }
 0x2c6   :  { %v449_v28 = vadd.f32 %v578_v26, %v448_v27 }
 0x2c7   :  { %v712_v29 = vpop.f32.mrf.mxu0 }
 0x2c8   :  { %v452_v30 = vmax.f32 %v449_v28, 0.0 }
 0x2ca   :  { %746 = vmatmul.mubr.f32.vlgmr.msra.gmra.mxu1 %v452_v30 }
 0x38a   :  { %v542_v32 = vpop.f32.mrf.mxu1 }
 0x38b   :  { %v543_v33 = vadd.f32 %v579_v31, %v542_v32 }
 0x38c   :  { %v747_v34 = vpop.f32.mrf.mxu1 }
 0x38d   :  { %769 = vtanh.f32 %v543_v33 }
 0x39a   :  { %v770_v36 = vpop.eup %769 }
 0x39b   :  { %v554_v38 = vmul.f32 %v770_v36, %v580_v0 }
 0x39d   :  { %v562_v39 = vadd.f32 %v581_v37, %v554_v38 }
 0x39f   :  { %564 = vst.msk [vmem:[%s1124_s11] sm:$0xff] %vm563_vm15, %v562_v39 }
 0x3a0   :  { %569 = vsyncpa [#allocation3], 1 }
 0x3a1   :  { %570 = vsyncpa [#allocation5], 1 }

// kernel: tpu_custom_call.1
= control target key start
LH: loop header
LB: loop body
LE: loop exit
PB: predicated region body
PF: predicated region fallthrough
CT: control target
= control target key end

     0   :  { %16 = vsyncpa [#allocation3], 0  ;;  %s1113_s0 = inlined_call_operand.vmem [shape: f32[8,16], index: 0, kind: input, shape index: {}]   ;;  %s1114_s1 = inlined_call_operand.hbm [shape: f32[16,128], index: 1, kind: input, shape index: {}]   ;;  %s1115_s2 = inlined_call_operand.vmem [shape: f32[1,128], index: 2, kind: input, shape index: {}]   ;;  %s1116_s3 = inlined_call_operand.vmem [shape: f32[128,128], index: 3, kind: input, shape index: {}]   ;;  %s1117_s4 = inlined_call_operand.hbm [shape: f32[1,128], index: 4, kind: input, shape index: {}]   ;;  %s1118_s5 = inlined_call_operand.hbm [shape: f32[128,128], index: 5, kind: input, shape index: {}]   ;;  %s1119_s6 = inlined_call_operand.vmem [shape: f32[1,128], index: 6, kind: input, shape index: {}]   ;;  %s1120_s7 = inlined_call_operand.vmem [shape: f32[128,4], index: 7, kind: input, shape index: {}]   ;;  %s1121_s8 = inlined_call_operand.vmem [shape: f32[1,4], index: 8, kind: input, shape index: {}]   ;;  %s1122_s9 = inlined_call_operand.vmem [shape: f32[1,4], index: 9, kind: input, shape index: {}]   ;;  %s1123_s10 = inlined_call_operand.vmem [shape: f32[1,4], index: 10, kind: input, shape index: {}]   ;;  %s1124_s11 = inlined_call_operand.vmem [shape: f32[8,4], index: 11, kind: output, shape index: {}]  }
   0x1   :  { %17 = vsyncpa [#allocation5], 0  ;;  %s835_s17 = smov [#allocation4]   ;;  %s836_s19 = smov [#allocation2]  }
   0x2   :  { %s42_s18 = sshll.u32 %s835_s17, 4  ;;  %s25_s20 = sshll.u32 %s836_s19, 4  ;;  %s43_s18 = int_to_ptr.vmem [resolvable:$true] %s42_s18  ;;  %s26_s20 = int_to_ptr.vmem [resolvable:$true] %s25_s20 }
   0x3   :  { %s779_s21 = scalar_lea.vmem %s43_s18, 16  ;;  %s783_s22 = scalar_lea.vmem %s43_s18, 32 }
   0x4   :  { %p780_p0 = scmp.ne.s32.totalorder %s43_s18, %s779_s21  ;;  %p784_p1 = scmp.lt.s32.totalorder %s43_s18, %s43_s18 }
   0x5   :  { %p785_p2 = scmp.lt.s32.totalorder %s783_s22, %s779_s21 }
   0x7   :  { %p786_p3 = por %p785_p2, %p784_p1 }
   0x9   :  { %p787_p4 = pnand %p786_p3, %p780_p0 }
   0xb   :  { %790 = shalt.err (!%p787_p4)
}
   0xc   :  { %45 = dma.hbm_to_vmem [thread:$0]  %s1117_s4, 16, %s43_s18, [#allocation5]  }
   0xd   :  { %s799_s25 = scalar_lea.vmem %s26_s20, 256  ;;  %p804_p6 = scmp.lt.s32.totalorder %s26_s20, %s26_s20 }
   0xe   :  { %p800_p5 = scmp.ne.s32.totalorder %s26_s20, %s799_s25  ;;  %p805_p7 = scmp.lt.s32.totalorder %s799_s25, %s799_s25 }
  0x10   :  { %p806_p8 = por %p805_p7, %p804_p6 }
  0x12   :  { %p807_p9 = pnand %p806_p8, %p800_p5 }
  0x14   :  { %810 = shalt.err (!%p807_p9)
}
  0x15   :  { %s837_s26 = smov 128   ;;  %s838_s27 = smov 8  }
  0x16   :  { %31 = dma.hbm_to_vmem [thread:$0]  %s1114_s1, 256, %s26_s20, [#allocation3], %s837_s26, %s837_s26, %s838_s27  }
  0x17   :  { %s839_s30 = smov [#allocation6]  }
  0x18   :  { %s51_s12 = sshll.u32 %s839_s30, 4  ;;  %s52_s12 = int_to_ptr.vmem [resolvable:$true] %s51_s12 }
  0x19   :  { %s819_s13 = scalar_lea.vmem %s52_s12, 2048  ;;  %p824_p11 = scmp.lt.s32.totalorder %s52_s12, %s52_s12 }
  0x1a   :  { %p820_p10 = scmp.ne.s32.totalorder %s52_s12, %s819_s13  ;;  %p825_p12 = scmp.lt.s32.totalorder %s819_s13, %s819_s13 }
  0x1c   :  { %p826_p13 = por %p825_p12, %p824_p11 }
  0x1e   :  { %p827_p0 = pnand %p826_p13, %p820_p10 }
  0x20   :  { %830 = shalt.err (!%p827_p0)
}
  0x21   :  { %57 = dma.hbm_to_vmem [thread:$0]  %s1118_s5, 2048, %s52_s12, [#allocation5], %s837_s26, %s837_s26, %s838_s27  }
  0x22   :  { %831 = dma.done.wait [#allocation3], 256  }
  0x23   :  { %832 = vsyncadd [#allocation3], 4294967040 }
  0x24   :  { %833 = dma.done.wait [#allocation5], 2064  }
  0x25   :  { %834 = vsyncadd [#allocation5], 4294965232  ;;  %v840_v0 = vmov 0.0   ;;  %vm841_vm0 = vmmov 0   ;;  %v79_v1 = vld [vmem:[#allocation2 + $0x8] sm:$0xff]  ;;  %v78_v2 = vld [vmem:[#allocation2] sm:$0xff] }
  0x26   :  { %636 = vmatprep.subr.mxu0 %v840_v0  ;;  %640 = vmatprep.mubr.msk.f32.mxu0 %vm841_vm0, %v840_v0  ;;  %v77_v3 = vld [vmem:[%s1113_s0] sm:$0xff]  ;;  %vm87_vm1 = vcmask 130048   ;;  %v280_v4 = vld [vmem:[%s1116_s3 + $0x78] sm:$0xff]  ;;  %v279_v5 = vld [vmem:[%s1116_s3 + $0x70] sm:$0xff]  ;;  %v842_v47 = vmov 683565275  }
  0x27   :  { %643 = vmatprep.subr.mxu1 %v840_v0  ;;  %675 = vmatprep.mubr.msk.f32.mxu1 %vm841_vm0, %v840_v0  ;;  %v278_v6 = vld [vmem:[%s1116_s3 + $0x68] sm:$0xff]  ;;  %v277_v7 = vld [vmem:[%s1116_s3 + $0x60] sm:$0xff]  ;;  %v276_v8 = vld [vmem:[%s1116_s3 + $0x58] sm:$0xff]  ;;  %v843_v49 = vmov 2475754826   ;;  %vm563_vm15 = vcmask 31744  }
  0x28   :  { %637 = vmatpush3.msra.mxu0 %v79_v1  ;;  %644 = vmatpush3.msra.mxu1 %v280_v4  ;;  %v275_v9 = vld [vmem:[%s1116_s3 + $0x50] sm:$0xff]  ;;  %v274_v10 = vld [vmem:[%s1116_s3 + $0x48] sm:$0xff]  ;;  %v273_v11 = vld [vmem:[%s1116_s3 + $0x40] sm:$0xff]  ;;  %v844_v52 = vmov 2131351028  }
  0x29   :  { %638 = vmatprep.subr.mxu0 %v840_v0  ;;  %645 = vmatprep.subr.mxu1 %v840_v0  ;;  %v272_v12 = vld [vmem:[%s1116_s3 + $0x38] sm:$0xff]  ;;  %v271_v13 = vld [vmem:[%s1116_s3 + $0x30] sm:$0xff]  ;;  %v270_v14 = vld [vmem:[%s1116_s3 + $0x28] sm:$0xff]  ;;  %v845_v55 = vmov 2102212464  }
  0x2a   :  { %639 = vmatpush3.msra.mxu0 %v78_v2  ;;  %646 = vmatpush3.msra.mxu1 %v279_v5  ;;  %v269_v15 = vld [vmem:[%s1116_s3 + $0x20] sm:$0xff]  ;;  %v268_v16 = vld [vmem:[%s1116_s3 + $0x18] sm:$0xff]  ;;  %v267_v17 = vld [vmem:[%s1116_s3 + $0x10] sm:$0xff]  ;;  %v846_v58 = vmov 920167782  }
  0x2b   :  { %641 = vmatmul.mubr.msk.f32.vlgmr.msra.gmra.mxu0 %vm87_vm1, %v77_v3  ;;  %678 = vmatprep.subr.mxu0 %v840_v0  ;;  %v266_v18 = vld [vmem:[%s1116_s3 + $0x8] sm:$0xff]  ;;  %v265_v19 = vld [vmem:[%s1116_s3] sm:$0xff]  ;;  %v371_v23 = vld [vmem:[#allocation6 + $0x60] sm:$0xff]  ;;  %v847_v61 = vmov 1326507024  }
  0x2c   :  { %710 = vmatprep.mubr.msk.f32.mxu0 %vm841_vm0, %v840_v0  ;;  %647 = vmatprep.subr.mxu1 %v840_v0  ;;  %v374_v20 = vld [vmem:[#allocation6 + $0x78] sm:$0xff]  ;;  %v373_v21 = vld [vmem:[#allocation6 + $0x70] sm:$0xff]  ;;  %v372_v22 = vld [vmem:[#allocation6 + $0x68] sm:$0xff] }
  0x2d   :  { %648 = vmatpush3.msra.mxu1 %v278_v6  ;;  %679 = vmatpush3.msra.mxu0 %v374_v20  ;;  %v370_v24 = vld [vmem:[#allocation6 + $0x58] sm:$0xff]  ;;  %v369_v25 = vld [vmem:[#allocation6 + $0x50] sm:$0xff]  ;;  %v368_v26 = vld [vmem:[#allocation6 + $0x48] sm:$0xff] }
  0x2e   :  { %649 = vmatprep.subr.mxu1 %v840_v0  ;;  %680 = vmatprep.subr.mxu0 %v840_v0  ;;  %v367_v27 = vld [vmem:[#allocation6 + $0x40] sm:$0xff]  ;;  %v366_v28 = vld [vmem:[#allocation6 + $0x38] sm:$0xff]  ;;  %v365_v29 = vld [vmem:[#allocation6 + $0x30] sm:$0xff] }
  0x2f   :  { %650 = vmatpush3.msra.mxu1 %v277_v7  ;;  %681 = vmatpush3.msra.mxu0 %v373_v21  ;;  %v364_v30 = vld [vmem:[#allocation6 + $0x28] sm:$0xff]  ;;  %v363_v31 = vld [vmem:[#allocation6 + $0x20] sm:$0xff]  ;;  %v362_v32 = vld [vmem:[#allocation6 + $0x18] sm:$0xff] }
  0x30   :  { %651 = vmatprep.subr.mxu1 %v840_v0  ;;  %682 = vmatprep.subr.mxu0 %v840_v0  ;;  %v571_v33 = vld [vmem:[%s1115_s2] ss:$0 sm:$0xff] }
  0x31   :  { %652 = vmatpush3.msra.mxu1 %v276_v8  ;;  %683 = vmatpush3.msra.mxu0 %v372_v22 }
  0x32   :  { %653 = vmatprep.subr.mxu1 %v840_v0  ;;  %684 = vmatprep.subr.mxu0 %v840_v0 }
  0x33   :  { %654 = vmatpush3.msra.mxu1 %v275_v9  ;;  %685 = vmatpush3.msra.mxu0 %v371_v23 }
  0x34   :  { %655 = vmatprep.subr.mxu1 %v840_v0  ;;  %686 = vmatprep.subr.mxu0 %v840_v0 }
  0x35   :  { %656 = vmatpush3.msra.mxu1 %v274_v10  ;;  %687 = vmatpush3.msra.mxu0 %v370_v24 }
  0x36   :  { %657 = vmatprep.subr.mxu1 %v840_v0  ;;  %688 = vmatprep.subr.mxu0 %v840_v0 }
  0x37   :  { %658 = vmatpush3.msra.mxu1 %v273_v11  ;;  %689 = vmatpush3.msra.mxu0 %v369_v25 }
  0x38   :  { %659 = vmatprep.subr.mxu1 %v840_v0  ;;  %690 = vmatprep.subr.mxu0 %v840_v0 }
  0x39   :  { %660 = vmatpush3.msra.mxu1 %v272_v12  ;;  %691 = vmatpush3.msra.mxu0 %v368_v26 }
  0x3a   :  { %661 = vmatprep.subr.mxu1 %v840_v0  ;;  %692 = vmatprep.subr.mxu0 %v840_v0 }
  0x3b   :  { %662 = vmatpush3.msra.mxu1 %v271_v13  ;;  %693 = vmatpush3.msra.mxu0 %v367_v27 }
  0x3c   :  { %663 = vmatprep.subr.mxu1 %v840_v0  ;;  %694 = vmatprep.subr.mxu0 %v840_v0 }
  0x3d   :  { %664 = vmatpush3.msra.mxu1 %v270_v14  ;;  %695 = vmatpush3.msra.mxu0 %v366_v28 }
  0x3e   :  { %665 = vmatprep.subr.mxu1 %v840_v0  ;;  %696 = vmatprep.subr.mxu0 %v840_v0 }
  0x3f   :  { %666 = vmatpush3.msra.mxu1 %v269_v15  ;;  %697 = vmatpush3.msra.mxu0 %v365_v29 }
  0x40   :  { %667 = vmatprep.subr.mxu1 %v840_v0  ;;  %698 = vmatprep.subr.mxu0 %v840_v0 }
  0x41   :  { %668 = vmatpush3.msra.mxu1 %v268_v16  ;;  %699 = vmatpush3.msra.mxu0 %v364_v30 }
  0x42   :  { %669 = vmatprep.subr.mxu1 %v840_v0  ;;  %700 = vmatprep.subr.mxu0 %v840_v0 }
  0x43   :  { %670 = vmatpush3.msra.mxu1 %v267_v17  ;;  %701 = vmatpush3.msra.mxu0 %v363_v31 }
  0x44   :  { %671 = vmatprep.subr.mxu1 %v840_v0  ;;  %702 = vmatprep.subr.mxu0 %v840_v0 }
  0x45   :  { %672 = vmatpush3.msra.mxu1 %v266_v18  ;;  %703 = vmatpush3.msra.mxu0 %v362_v32 }
  0x46   :  { %673 = vmatprep.subr.mxu1 %v840_v0  ;;  %704 = vmatprep.subr.mxu0 %v840_v0 }
  0x47   :  { %674 = vmatpush3.msra.mxu1 %v265_v19 }
  0x48   :  { %713 = vmatprep.subr.mxu1 %v840_v0 }
  0xeb   :  { %v157_v34 = vpop.f32.mrf.mxu0 }
  0xec   :  { %v1010_v35 = vadd.f32 %v571_v33, %v157_v34 }
  0xed   :  { %v642_v36 = vpop.f32.mrf.mxu0 }
  0xee   :  { %v164_v37 = vand.u32 2139095040, %v1010_v35  ;;  %v161_v41 = vand.u32 2147483647, %v1010_v35  ;;  %vm163_vm9 = vcmp.lt.s32.totalorder %v1010_v35, 0  ;;  %vm253_vm14 = vweird.f32 %v1010_v35 }
  0xf0   :  { %v165_v38 = vshrl.u32 %v164_v37, 23  ;;  %v168_v44 = vand.u32 8388607, %v161_v41  ;;  %vm162_vm10 = vcmp.le.f32.partialorder %v161_v41, 0.7853982 }
  0xf2   :  { %v573_v39 = vadd.s32 4294967169, %v165_v38  ;;  %v169_v63 = vor.u32 8388608, %v168_v44 }
  0xf4   :  { %v171_v40 = vadd.s32 1, %v573_v39  ;;  %v209_v14 = vshll.u32 %v169_v63, 8 }
  0xf6   :  { %vm172_vm2 = vcmp.gt.s32.totalorder %v171_v40, 0 }
  0xf7   :  { %v173_v42 = vsel %vm172_vm2, %v171_v40, 0 }
  0xf8   :  { %v175_v43 = vand.u32 31, %v173_v42  ;;  %v174_v46 = vshrl.u32 %v173_v42, 5 }
  0xfa   :  { %v176_v45 = vsub.s32 32, %v175_v43  ;;  %v178_v48 = vshll.u32 %v842_v47, %v175_v43  ;;  %v181_v50 = vshll.u32 %v843_v49, %v175_v43  ;;  %v184_v54 = vshll.u32 %v844_v52, %v175_v43 }
  0xfb   :  { %v187_v57 = vshll.u32 %v845_v55, %v175_v43  ;;  %v190_v60 = vshll.u32 %v846_v58, %v175_v43  ;;  %vm193_vm3 = vcmp.lt.s32.totalorder %v174_v46, 1  ;;  %vm196_vm4 = vcmp.lt.s32.totalorder %v174_v46, 4 }
  0xfc   :  { %v179_v51 = vshrl.u32 %v843_v49, %v176_v45  ;;  %v182_v53 = vshrl.u32 %v844_v52, %v176_v45  ;;  %v185_v56 = vshrl.u32 %v845_v55, %v176_v45  ;;  %v188_v59 = vshrl.u32 %v846_v58, %v176_v45 }
  0xfd   :  { %v191_v62 = vshrl.u32 %v847_v61, %v176_v45  ;;  %v177_v9 = vshrl.u32 %v842_v47, %v176_v45  ;;  %vm195_vm5 = vcmp.lt.s32.totalorder %v174_v46, 3  ;;  %vm194_vm6 = vcmp.lt.s32.totalorder %v174_v46, 2 }
  0xfe   :  { %v180_v1 = vor.u32 %v179_v51, %v178_v48  ;;  %v183_v2 = vor.u32 %v182_v53, %v181_v50  ;;  %v186_v3 = vor.u32 %v185_v56, %v184_v54  ;;  %v189_v4 = vor.u32 %v188_v59, %v187_v57 }
  0xff   :  { %v192_v5 = vor.u32 %v191_v62, %v190_v60 }
 0x100   :  { %v198_v6 = vsel %vm196_vm4, %v186_v3, 2102212464  ;;  %v201_v7 = vsel %vm193_vm3, %v180_v1, %v183_v2  ;;  %v205_v8 = vsel %vm193_vm3, %v183_v2, %v186_v3  ;;  %v202_v10 = vsel %vm196_vm4, %v189_v4, 920167782 }
 0x101   :  { %v206_v11 = vsel %vm196_vm4, %v192_v5, 1326507024  ;;  %v203_v12 = vsel %vm195_vm5, %v186_v3, %v202_v10  ;;  %v197_v15 = vsel %vm193_vm3, %v177_v9, %v180_v1  ;;  %v199_v16 = vsel %vm195_vm5, %v183_v2, %v198_v6  ;;  %v361_v3 = vld [vmem:[#allocation6 + $0x10] sm:$0xff]  ;;  %v359_v5 = vld [vmem:[#allocation6] sm:$0xff] }
 0x102   :  { %v207_v13 = vsel %vm195_vm5, %v189_v4, %v206_v11  ;;  %v204_v17 = vsel %vm194_vm6, %v201_v7, %v203_v12  ;;  %v200_v23 = vsel %vm194_vm6, %v197_v15, %v199_v16  ;;  %705 = vmatpush3.msra.mxu0 %v361_v3  ;;  %v360_v4 = vld [vmem:[#allocation6 + $0x8] sm:$0xff]  ;;  %v467_v6 = vld [vmem:[%s1120_s7 + $0x70] sm:$0xff]  ;;  %v466_v7 = vld [vmem:[%s1120_s7 + $0x68] sm:$0xff] }
 0x103   :  { %v208_v18 = vsel %vm194_vm6, %v205_v8, %v207_v13  ;;  %v1019_v21 = vmul.u32.u64.low %v209_v14, %v204_v17  ;;  %v1020_v22 = vmul.u32.u64.high %v209_v14, %v204_v17, %v1019_v21  ;;  %v216_v25 = vmul.u32 %v209_v14, %v200_v23  ;;  %706 = vmatprep.subr.mxu0 %v840_v0  ;;  %v465_v8 = vld [vmem:[%s1120_s7 + $0x60] sm:$0xff]  ;;  %v464_v9 = vld [vmem:[%s1120_s7 + $0x58] sm:$0xff]  ;;  %v463_v10 = vld [vmem:[%s1120_s7 + $0x50] sm:$0xff] }
 0x104   :  { %v1016_v19 = vmul.u32.u64.low %v209_v14, %v208_v18  ;;  %v1017_v20 = vmul.u32.u64.high %v209_v14, %v208_v18, %v1016_v19  ;;  %707 = vmatpush3.msra.mxu0 %v360_v4  ;;  %v462_v11 = vld [vmem:[%s1120_s7 + $0x48] sm:$0xff]  ;;  %v461_v12 = vld [vmem:[%s1120_s7 + $0x40] sm:$0xff]  ;;  %v460_v13 = vld [vmem:[%s1120_s7 + $0x38] sm:$0xff] }
 0x105   :  { %v219_v24 = vadd.s32 1, %v1020_v22  ;;  %708 = vmatprep.subr.mxu0 %v840_v0  ;;  %v459_v14 = vld [vmem:[%s1120_s7 + $0x30] sm:$0xff]  ;;  %v458_v15 = vld [vmem:[%s1120_s7 + $0x28] sm:$0xff]  ;;  %v457_v16 = vld [vmem:[%s1120_s7 + $0x20] sm:$0xff] }
 0x106   :  { %vm218_vm7 = vc.u32 %v1017_v20, %v1019_v21  ;;  %v217_v38 = vadd.s32 %v1019_v21, %v1017_v20  ;;  %709 = vmatpush3.msra.mxu0 %v359_v5  ;;  %v456_v17 = vld [vmem:[%s1120_s7 + $0x18] sm:$0xff]  ;;  %v577_v18 = vld [vmem:[#allocation4] ss:$0 sm:$0xff] }
 0x107   :  { %v220_v26 = vsel %vm218_vm7, %v219_v24, %v1020_v22  ;;  %v455_v23 = vld [vmem:[%s1120_s7 + $0x10] sm:$0xff]  ;;  %v454_v24 = vld [vmem:[%s1120_s7 + $0x8] sm:$0xff] }
 0x108   :  { %v221_v27 = vadd.s32 %v220_v26, %v216_v25  ;;  %v453_v25 = vld [vmem:[%s1120_s7] sm:$0xff] }
 0x109   :  { %v578_v26 = vld [vmem:[%s1119_s6] ss:$0 sm:$0xff] }
 0x10a   :  { %v222_v28 = vadd.s32 536870912, %v221_v27 }
 0x10c   :  { %v223_v29 = vshrl.u32 %v222_v28, 30 }
 0x10e   :  { %v224_v30 = vshll.u32 %v223_v29, 30  ;;  %v247_v52 = vsub.s32 4, %v223_v29 }
 0x110   :  { %v225_v31 = vsub.s32 %v221_v27, %v224_v30  ;;  %v248_v55 = vsel %vm163_vm9, %v247_v52, %v223_v29 }
 0x111   :  { %v250_v56 = vsel %vm162_vm10, 0, %v248_v55 }
 0x112   :  { %v227_v32 = vsub.s32 0, %v225_v31  ;;  %v254_v57 = vadd.s32 3, %v250_v56 }
 0x114   :  { %v574_v33 = vmin.u32 %v227_v32, %v225_v31  ;;  %v255_v58 = vand.u32 3, %v254_v57 }
 0x116   :  { %v229_v34 = vclz %v574_v33  ;;  %vm260_vm11 = vcmp.eq.s32.totalorder %v255_v58, 2  ;;  %vm257_vm12 = vcmp.eq.s32.totalorder %v255_v58, 0  ;;  %vm256_vm13 = vcmp.lt.s32.totalorder %v255_v58, 2 }
 0x118   :  { %v575_v36 = vadd.s32 4294967294, %v229_v34 }
 0x11a   :  { %vm576_vm8 = vcmp.lt.s32.totalorder %v575_v36, 0 }
 0x11b   :  { %v232_v37 = vsel %vm576_vm8, 0, %v575_v36 }
 0x11c   :  { %v233_v39 = vsub.s32 32, %v232_v37  ;;  %v237_v40 = vsub.s32 4294967266, %v232_v37  ;;  %v234_v42 = vshll.u32 %v225_v31, %v232_v37  ;;  %v579_v31 = vld [vmem:[%s1121_s8] ss:$0 sm:$0xff] }
 0x11d   :  { %v581_v37 = vld [vmem:[%s1123_s10] ss:$0 sm:$0xff] }
 0x11e   :  { %v235_v43 = vshrl.u32 %v217_v38, %v233_v39  ;;  %v238_v44 = vadd.s32 127, %v237_v40 }
 0x120   :  { %v236_v45 = vor.u32 %v235_v43, %v234_v42  ;;  %v239_v46 = vshll.u32 %v238_v44, 23 }
 0x122   :  { %v240_v47 = vor.u32 4788187, %v239_v46  ;;  %v243_v49 = vcvt.s32.f32 %v236_v45 }
 0x124   :  { %v241_v48 = vand.u32 2147483647, %v240_v47 }
 0x126   :  { %v244_v50 = vmul.f32 %v243_v49, %v241_v48 }
 0x128   :  { %v245_v51 = vxor.u32 2147483648, %v244_v50 }
 0x12a   :  { %v246_v53 = vsel %vm163_vm9, %v245_v51, %v244_v50 }
 0x12b   :  { %v249_v54 = vsel %vm162_vm10, %v1010_v35, %v246_v53  ;;  %v468_v35 = vld [vmem:[%s1120_s7 + $0x78] sm:$0xff] }
 0x12c   :  { %765 = vcosq.f32 %v249_v54 }
 0x12d   :  { %767 = vsinq.f32 %v249_v54 }
 0x139   :  { %v766_v59 = vpop.eup %765 }
 0x13a   :  { %v768_v60 = vpop.eup %767  ;;  %v261_v61 = vxor.u32 2147483648, %v766_v59 }
 0x13b   :  { %v258_v62 = vxor.u32 2147483648, %v768_v60 }
 0x13c   :  { %v262_v63 = vsel %vm260_vm11, %v261_v61, %v768_v60 }
 0x13d   :  { %v259_v1 = vsel %vm257_vm12, %v766_v59, %v258_v62 }
 0x13e   :  { %v263_v41 = vsel %vm256_vm13, %v259_v1, %v262_v63 }
 0x13f   :  { %v264_v2 = vsel %vm253_vm14, nan, %v263_v41 }
 0x140   :  { %676 = vmatmul.mubr.f32.vlgmr.msra.gmra.mxu1 %v264_v2 }
 0x141   :  { %745 = vmatprep.mubr.msk.f32.mxu1 %vm841_vm0, %v840_v0  ;;  %714 = vmatpush3.msra.mxu1 %v468_v35 }
 0x142   :  { %715 = vmatprep.subr.mxu1 %v840_v0 }
 0x143   :  { %716 = vmatpush3.msra.mxu1 %v467_v6 }
 0x144   :  { %717 = vmatprep.subr.mxu1 %v840_v0 }
 0x145   :  { %718 = vmatpush3.msra.mxu1 %v466_v7 }
 0x146   :  { %719 = vmatprep.subr.mxu1 %v840_v0 }
 0x147   :  { %720 = vmatpush3.msra.mxu1 %v465_v8 }
 0x148   :  { %721 = vmatprep.subr.mxu1 %v840_v0 }
 0x149   :  { %722 = vmatpush3.msra.mxu1 %v464_v9 }
 0x14a   :  { %723 = vmatprep.subr.mxu1 %v840_v0 }
 0x14b   :  { %724 = vmatpush3.msra.mxu1 %v463_v10 }
 0x14c   :  { %725 = vmatprep.subr.mxu1 %v840_v0 }
 0x14d   :  { %726 = vmatpush3.msra.mxu1 %v462_v11 }
 0x14e   :  { %727 = vmatprep.subr.mxu1 %v840_v0 }
 0x14f   :  { %728 = vmatpush3.msra.mxu1 %v461_v12 }
 0x150   :  { %729 = vmatprep.subr.mxu1 %v840_v0 }
 0x151   :  { %730 = vmatpush3.msra.mxu1 %v460_v13 }
 0x152   :  { %731 = vmatprep.subr.mxu1 %v840_v0 }
 0x153   :  { %732 = vmatpush3.msra.mxu1 %v459_v14 }
 0x154   :  { %733 = vmatprep.subr.mxu1 %v840_v0 }
 0x155   :  { %734 = vmatpush3.msra.mxu1 %v458_v15 }
 0x156   :  { %735 = vmatprep.subr.mxu1 %v840_v0 }
 0x157   :  { %736 = vmatpush3.msra.mxu1 %v457_v16 }
 0x158   :  { %737 = vmatprep.subr.mxu1 %v840_v0 }
 0x159   :  { %738 = vmatpush3.msra.mxu1 %v456_v17 }
 0x15a   :  { %739 = vmatprep.subr.mxu1 %v840_v0 }
 0x15b   :  { %740 = vmatpush3.msra.mxu1 %v455_v23 }
 0x15c   :  { %741 = vmatprep.subr.mxu1 %v840_v0 }
 0x15d   :  { %742 = vmatpush3.msra.mxu1 %v454_v24 }
 0x15e   :  { %743 = vmatprep.subr.mxu1 %v840_v0  ;;  %v580_v0 = vld [vmem:[%s1122_s9] ss:$0 sm:$0xff] }
 0x15f   :  { %744 = vmatpush3.msra.mxu1 %v453_v25 }
 0x200   :  { %v354_v19 = vpop.f32.mrf.mxu1 }
 0x201   :  { %v355_v20 = vadd.f32 %v577_v18, %v354_v19 }
 0x202   :  { %v677_v21 = vpop.f32.mrf.mxu1 }
 0x203   :  { %v358_v22 = vmax.f32 %v355_v20, 0.0 }
 0x205   :  { %711 = vmatmul.mubr.f32.vlgmr.msra.gmra.mxu0 %v358_v22 }
 0x2c5   :  { %v448_v27 = vpop.f32.mrf.mxu0 }
 0x2c6   :  { %v449_v28 = vadd.f32 %v578_v26, %v448_v27 }
 0x2c7   :  { %v712_v29 = vpop.f32.mrf.mxu0 }
 0x2c8   :  { %v452_v30 = vmax.f32 %v449_v28, 0.0 }
 0x2ca   :  { %746 = vmatmul.mubr.f32.vlgmr.msra.gmra.mxu1 %v452_v30 }
 0x38a   :  { %v542_v32 = vpop.f32.mrf.mxu1 }
 0x38b   :  { %v543_v33 = vadd.f32 %v579_v31, %v542_v32 }
 0x38c   :  { %v747_v34 = vpop.f32.mrf.mxu1 }
 0x38d   :  { %769 = vtanh.f32 %v543_v33 }
 0x39a   :  { %v770_v36 = vpop.eup %769 }
 0x39b   :  { %v554_v38 = vmul.f32 %v770_v36, %v580_v0 }
 0x39d   :  { %v562_v39 = vadd.f32 %v581_v37, %v554_v38 }
 0x39f   :  { %564 = vst.msk [vmem:[%s1124_s11] sm:$0xff] %vm563_vm15, %v562_v39 }
 0x3a0   :  { %569 = vsyncpa [#allocation3], 1 }
 0x3a1   :  { %570 = vsyncpa [#allocation5], 1 }

</bundles_post_ra>
